<compile_context>
chip_gen: v5e
topology: v5e:2x2
jax: 0.10.0
libtpu: 0.0.40
codegen_flags: <defaults>
</compile_context>

<pallas_src>
import functools

import jax
import jax.numpy as jnp
from jax import lax
from jax.experimental import pallas as pl
from jax.experimental.pallas import tpu as pltpu


def _round_up(n, m):
    return ((n + m - 1) // m) * m


# ----------------------------------------------------------------------------
# Stage 1: projection kernel
#   h  = x @ W                    (stored bf16)
#   f1 = x @ (W a1)   as [N, 1]   (folded weights -> contract over Fin)
#   f2 = (W a2)^T x^T as [1, N]   (row layout: stage 2 never transposes)
# ----------------------------------------------------------------------------
def _proj_kernel(x_ref, w_ref, wa_ref, h_ref, f1_ref, f2_ref):
    x = x_ref[...].astype(jnp.float32)
    w = w_ref[...].astype(jnp.float32)
    h = jnp.dot(x, w, preferred_element_type=jnp.float32)            # [tq, F]

    wa = wa_ref[...].astype(jnp.float32)                              # [2, Fin]
    dn = (((1,), (1,)), ((), ()))                                     # contract Fin
    # f1: [tq,Fin] x [1,Fin] -> [tq,1]
    f1 = lax.dot_general(x, wa[0:1, :], dn, preferred_element_type=jnp.float32)
    # f2: [1,Fin] x [tq,Fin] -> [1,tq]
    f2 = lax.dot_general(wa[1:2, :], x, dn, preferred_element_type=jnp.float32)

    h_ref[...] = h.astype(h_ref.dtype)                                # bf16
    f1_ref[...] = f1
    f2_ref[...] = f2


# ----------------------------------------------------------------------------
# Stage 2: tiled online-softmax attention (flash-attention style)
#   grid = (row blocks [parallel], key blocks [arbitrary, last])
#   h is VMEM-resident (full-array block, constant index map, bf16)
# ----------------------------------------------------------------------------
def _attn_kernel(nz_ref, f1_ref, f2_ref, mask_ref, h_ref, out_ref,
                 m_scr, l_scr, acc_scr, *, alpha, apply_elu, block_k):
    i = pl.program_id(0)
    k = pl.program_id(1)
    nk = pl.num_programs(1)

    @pl.when(k == 0)
    def _():
        m_scr[...] = jnp.full(m_scr.shape, -jnp.inf, m_scr.dtype)
        l_scr[...] = jnp.zeros(l_scr.shape, l_scr.dtype)
        acc_scr[...] = jnp.zeros(acc_scr.shape, acc_scr.dtype)

    # Skip tiles whose (tq, tk) neighbor-mask window is entirely empty.
    @pl.when(nz_ref[i * nk + k] != 0)
    def _():
        # logits tile: e[i,j] = leaky_relu(f1[i] + f2[j]), masked by distance<=250
        e = f1_ref[...] + f2_ref[...]                                 # [tq,1]+[1,tk]
        e = jnp.where(e > 0, e, alpha * e)                            # LeakyReLU(alpha)
        logits = jnp.where(mask_ref[...] != 0, e, -1.0e10)            # scalar literal

        # online softmax update (all f32)
        m_prev = m_scr[...]
        m_new = jnp.maximum(m_prev, jnp.max(logits, axis=1, keepdims=True))
        corr = jnp.exp(m_prev - m_new)                                # exp(-inf)=0 at start
        p = jnp.exp(logits - m_new)                                   # [tq, tk]
        l_scr[...] = corr * l_scr[...] + jnp.sum(p, axis=1, keepdims=True)

        # value tile sliced from the VMEM-resident bf16 h; p cast to bf16 for the MXU,
        # accumulation stays f32.
        kv_start = pl.multiple_of(k * block_k, block_k)
        h_blk = h_ref[pl.ds(kv_start, block_k), :]                    # [tk, F] bf16
        acc_scr[...] = corr * acc_scr[...] + jnp.dot(
            p.astype(jnp.bfloat16), h_blk, preferred_element_type=jnp.float32)
        m_scr[...] = m_new

    @pl.when(k == nk - 1)
    def _():
        inv_l = pl.reciprocal(l_scr[...], approx=True)                # EUP vrcp (free slot)
        out = acc_scr[...] * inv_l
        if apply_elu:
            # clamp before exp so the unselected branch never produces inf
            out = jnp.where(out > 0, out, jnp.exp(jnp.minimum(out, 0.0)) - 1.0)
        out_ref[...] = out.astype(out_ref.dtype)


# ----------------------------------------------------------------------------
# Wrapper
# ----------------------------------------------------------------------------
def graph_attention_layer(x, W, a, distance, *, alpha=0.2, concat=True,
                          block_q=None, block_k=None, skip_empty_tiles=True):
    """x:[N,Fin], W:[Fin,Fout], a:[2*Fout,1], distance:[N,N] -> [N,Fout]."""
    N, in_features = x.shape
    out_features = W.shape[1]

    # ---- tile selection (multiples of 128 so every BlockSpec is (8,128)-legal)
    tq = 256 if block_q is None else max(128, _round_up(int(block_q), 128))
    tq = min(tq, _round_up(N, 128))
    # v7x dual-TensorCore: keep >=2 steps on the "parallel" row axis when possible
    while tq > 128 and _round_up(N, tq) // tq < 2:
        tq -= 128
    n_pad = _round_up(N, tq)

    tk = 512 if block_k is None else max(128, _round_up(int(block_k), 128))
    tk = min(tk, n_pad)
    while n_pad % tk:          # terminates at 128 since 128 | n_pad
        tk -= 128

    gi, gk = n_pad // tq, n_pad // tk

    # ---- host-side prep (all cheap O(N·F) / O(N^2 / tile) work)
    x32 = jnp.zeros((n_pad, in_features), jnp.float32).at[:N, :].set(
        jnp.asarray(x, jnp.float32))
    w32 = jnp.asarray(W, jnp.float32)
    a32 = jnp.asarray(a, jnp.float32)
    # folded attention weights: f1 = x @ (W a1), f2 = x @ (W a2)
    wa = jnp.concatenate([w32 @ a32[:out_features, :],
                          w32 @ a32[out_features:, :]], axis=1).T      # [2, Fin]

    # int8 neighbor mask (4x less HBM than streaming f32 distances)
    mask = jnp.zeros((n_pad, n_pad), jnp.int8).at[:N, :N].set(
        (jnp.asarray(distance) <= 250.0).astype(jnp.int8))
    if n_pad > N:
        # padded rows attend to their own (zero) h row -> finite, sliced-off output
        pad_idx = jnp.arange(N, n_pad)
        mask = mask.at[pad_idx, pad_idx].set(1)

    # per-(tq,tk)-tile occupancy for block-sparse skipping (scalar-prefetched to SMEM)
    if skip_empty_tiles:
        tile_nz = jnp.any(mask.reshape(gi, tq, gk, tk) != 0, axis=(1, 3))
        tile_nz = tile_nz.astype(jnp.int32).reshape(gi * gk)
    else:
        tile_nz = jnp.ones((gi * gk,), jnp.int32)

    # VMEM budget: resident bf16 h + double-buffered tiles; stay modest for v7x (64 MiB),
    # grow only as much as the resident value matrix needs on v5e/v6e.
    resident_h_bytes = n_pad * out_features * 2
    vmem_limit = int(min(100 << 20, (32 << 20) + 2 * resident_h_bytes))

    # ---- Stage 1: projection (h stored bf16; f1 column, f2 row)
    h, f1, f2row = pl.pallas_call(
        _proj_kernel,
        out_shape=(
            jax.ShapeDtypeStruct((n_pad, out_features), jnp.bfloat16),
            jax.ShapeDtypeStruct((n_pad, 1), jnp.float32),
            jax.ShapeDtypeStruct((1, n_pad), jnp.float32),
        ),
        grid_spec=pltpu.PrefetchScalarGridSpec(
            num_scalar_prefetch=0,
            grid=(gi,),
            in_specs=[
                pl.BlockSpec((tq, in_features), lambda i: (i, 0)),
                pl.BlockSpec((in_features, out_features), lambda i: (0, 0)),
                pl.BlockSpec((2, in_features), lambda i: (0, 0)),
            ],
            out_specs=[
                pl.BlockSpec((tq, out_features), lambda i: (i, 0)),
                pl.BlockSpec((tq, 1), lambda i: (i, 0)),
                pl.BlockSpec((1, tq), lambda i: (0, i)),
            ],
        ),
        compiler_params=pltpu.CompilerParams(
            dimension_semantics=("parallel",),
            vmem_limit_bytes=32 * 1024 * 1024,
        ),
    )(x32, w32, wa)

    # ---- Stage 2: tiled attention with online softmax + block-sparse skipping
    kernel = functools.partial(_attn_kernel, alpha=float(alpha),
                               apply_elu=bool(concat), block_k=tk)
    out = pl.pallas_call(
        kernel,
        out_shape=jax.ShapeDtypeStruct((n_pad, out_features), jnp.float32),
        grid_spec=pltpu.PrefetchScalarGridSpec(
            num_scalar_prefetch=1,                                    # tile_nz -> SMEM
            grid=(gi, gk),                                            # reduction (key) axis last
            in_specs=[
                pl.BlockSpec((tq, 1), lambda i, k, nz: (i, 0)),       # f1 column block
                pl.BlockSpec((1, tk), lambda i, k, nz: (0, k)),       # f2 row block
                pl.BlockSpec((tq, tk), lambda i, k, nz: (i, k)),      # int8 mask tile
                pl.BlockSpec((n_pad, out_features),
                             lambda i, k, nz: (0, 0)),                # h: VMEM-resident bf16
            ],
            out_specs=pl.BlockSpec((tq, out_features), lambda i, k, nz: (i, 0)),
            scratch_shapes=[
                pltpu.VMEM((tq, 1), jnp.float32),             # running max m
                pltpu.VMEM((tq, 1), jnp.float32),             # running denom l
                pltpu.VMEM((tq, out_features), jnp.float32),  # f32 accumulator
            ],
        ),
        compiler_params=pltpu.CompilerParams(
            dimension_semantics=("parallel", "arbitrary"),
            vmem_limit_bytes=vmem_limit,
        ),
    )(tile_nz, f1, f2row, mask, h)

    return out[:N, :]


# ----------------------------------------------------------------------------
# Pure-JAX reference (mirrors the torch forward in eval mode)
# ----------------------------------------------------------------------------
def _reference(x, W, a, distance, alpha, concat):
    h = x @ W
    F = W.shape[1]
    f1 = h @ a[:F, 0][:, None]
    f2 = h @ a[F:, 0][:, None]
    e = f1 + f2.T
    e = jnp.where(e > 0, e, alpha * e)
    att = jnp.where(distance <= 250.0, e, -1.0e10)
    att = jax.nn.softmax(att, axis=1)
    h_prime = att @ h
    return jax.nn.elu(h_prime) if concat else h_prime


if __name__ == "__main__":
    key = jax.random.PRNGKey(0)
    in_features = 64
    out_features = 128   # lane-dense output (multiple of 128 -> unmasked vst)
    alpha = 0.2
    # bf16 h / bf16 probabilities trade ~1e-3 relative error for ~3x MXU throughput;
    # accumulation stays f32, so a 5e-3 tolerance is comfortable.
    TOL = 5e-3

    def xavier_uniform(k, shape, gain):
        fan_in, fan_out = shape
        bound = gain * jnp.sqrt(6.0 / (fan_in + fan_out))
        return jax.random.uniform(k, shape, jnp.float32, -bound, bound)

    k1, k2, k3, k4 = jax.random.split(key, 4)
    W = xavier_uniform(k2, (in_features, out_features), 1.414)
    a = xavier_uniform(k3, (2 * out_features, 1), 1.414)

    # ---- Test 1: banded (spatially local) distances, 128x128 blocks
    #      -> 4x4 grid, multi-block online softmax, many fully-masked tiles skipped.
    N = 512
    x = jax.random.normal(k1, (N, in_features), jnp.float32)
    idx = jnp.arange(N, dtype=jnp.float32)
    distance = jnp.abs(idx[:, None] - idx[None, :]) * 3.0 \
        + jax.random.uniform(k4, (N, N), jnp.float32, 0.0, 50.0)
    distance = distance.at[jnp.arange(N), jnp.arange(N)].set(0.0)

    out = graph_attention_layer(x, W, a, distance, alpha=alpha, concat=True,
                                block_q=128, block_k=128)
    out = jax.block_until_ready(out)
    ref = _reference(x, W, a, distance, alpha, True)
    assert jnp.allclose(out, ref, atol=TOL, rtol=TOL), (
        f"test1 max err {float(jnp.max(jnp.abs(out - ref)))}")

    # ---- Test 2: dense random distances, default tiles (tq=256, tk=512), concat=False.
    distance2 = jax.random.uniform(k4, (N, N), jnp.float32, 0.0, 500.0)
    distance2 = distance2.at[jnp.arange(N), jnp.arange(N)].set(0.0)
    out2 = graph_attention_layer(x, W, a, distance2, alpha=alpha, concat=False)
    out2 = jax.block_until_ready(out2)
    ref2 = _reference(x, W, a, distance2, alpha, False)
    assert jnp.allclose(out2, ref2, atol=TOL, rtol=TOL), (
        f"test2 max err {float(jnp.max(jnp.abs(out2 - ref2)))}")

    # ---- Test 3: non-divisible N (exercises the padding + slicing path).
    N3 = 200
    k5, k6 = jax.random.split(k4)
    x3 = jax.random.normal(k5, (N3, in_features), jnp.float32)
    distance3 = jax.random.uniform(k6, (N3, N3), jnp.float32, 0.0, 500.0)
    distance3 = distance3.at[jnp.arange(N3), jnp.arange(N3)].set(0.0)
    out3 = graph_attention_layer(x3, W, a, distance3, alpha=alpha, concat=True)
    out3 = jax.block_until_ready(out3)
    ref3 = _reference(x3, W, a, distance3, alpha, True)
    assert out3.shape == (N3, out_features)
    assert jnp.allclose(out3, ref3, atol=TOL, rtol=TOL), (
        f"test3 max err {float(jnp.max(jnp.abs(out3 - ref3)))}")

    print("KERNEL_OK")
</pallas_src>

<mosaic_0001>
module attributes {stable_mosaic.version = 11 : i64} {
  func.func @_proj_kernel(%arg0: i32, %arg1: memref<128x64xf32, #tpu.memory_space<vmem>>, %arg2: memref<64x128xf32, #tpu.memory_space<vmem>>, %arg3: memref<2x64xf32, #tpu.memory_space<vmem>>, %arg4: memref<128x128xbf16, #tpu.memory_space<vmem>>, %arg5: memref<128x1xf32, #tpu.memory_space<vmem>>, %arg6: memref<1x128xf32, #tpu.memory_space<vmem>>) attributes {dimension_semantics = [#tpu.dimension_semantics<parallel>], iteration_bounds = array<i64: 4>, scalar_prefetch = 0 : i64, scratch_operands = 0 : i64, tpu.core_type = #tpu.core_type<tc>, window_params = [{transform_indices = @transform_0, window_bounds = array<i64: 128, 64>}, {pipeline_mode = #tpu.pipeline_mode<synchronous>, transform_indices = @transform_1, window_bounds = array<i64: 64, 128>}, {pipeline_mode = #tpu.pipeline_mode<synchronous>, transform_indices = @transform_2, window_bounds = array<i64: 2, 64>}, {transform_indices = @transform_3, window_bounds = array<i64: 128, 128>}, {transform_indices = @transform_4, window_bounds = array<i64: 128, 1>}, {transform_indices = @transform_5, window_bounds = array<i64: 1, 128>}]} {
    %c0 = arith.constant 0 : index
    %c0_0 = arith.constant 0 : index
    %0 = vector.load %arg1[%c0, %c0_0] : memref<128x64xf32, #tpu.memory_space<vmem>>, vector<128x64xf32>
    %c0_1 = arith.constant 0 : index
    %c0_2 = arith.constant 0 : index
    %1 = vector.load %arg2[%c0_1, %c0_2] : memref<64x128xf32, #tpu.memory_space<vmem>>, vector<64x128xf32>
    %cst = arith.constant dense<0.000000e+00> : vector<128x128xf32>
    %2 = tpu.matmul %0, %1, %cst {dimension_numbers = #tpu.dot_dimension_numbers<[1], [0], [0], [1], [0, 0, 1, 1], [], []>} : vector<128x64xf32>, vector<64x128xf32>, vector<128x128xf32> -> vector<128x128xf32>
    %c0_3 = arith.constant 0 : index
    %c0_4 = arith.constant 0 : index
    %3 = vector.load %arg3[%c0_3, %c0_4] : memref<2x64xf32, #tpu.memory_space<vmem>>, vector<2x64xf32>
    %4 = vector.extract_strided_slice %3 {offsets = [0, 0], sizes = [1, 64], strides = [1, 1]} : vector<2x64xf32> to vector<1x64xf32>
    %cst_5 = arith.constant dense<0.000000e+00> : vector<128x1xf32>
    %5 = tpu.matmul %0, %4, %cst_5 {dimension_numbers = #tpu.dot_dimension_numbers<[1], [1], [0], [0], [0, 0, 1, 0], [], []>} : vector<128x64xf32>, vector<1x64xf32>, vector<128x1xf32> -> vector<128x1xf32>
    %6 = vector.extract_strided_slice %3 {offsets = [1, 0], sizes = [1, 64], strides = [1, 1]} : vector<2x64xf32> to vector<1x64xf32>
    %cst_6 = arith.constant dense<0.000000e+00> : vector<1x128xf32>
    %7 = tpu.matmul %6, %0, %cst_6 {dimension_numbers = #tpu.dot_dimension_numbers<[1], [1], [0], [0], [0, 0, 1, 0], [], []>} : vector<1x64xf32>, vector<128x64xf32>, vector<1x128xf32> -> vector<1x128xf32>
    %8 = arith.truncf %2 : vector<128x128xf32> to vector<128x128xbf16>
    %c0_7 = arith.constant 0 : index
    %c0_8 = arith.constant 0 : index
    %9 = vector.load %arg4[%c0_7, %c0_8] : memref<128x128xbf16, #tpu.memory_space<vmem>>, vector<128x128xbf16>
    tpu.vector_store %arg4[%c0_7, %c0_8], %8 {strides = array<i32>} : memref<128x128xbf16, #tpu.memory_space<vmem>>, vector<128x128xbf16>,
    %c0_9 = arith.constant 0 : index
    %c0_10 = arith.constant 0 : index
    %10 = vector.load %arg5[%c0_9, %c0_10] : memref<128x1xf32, #tpu.memory_space<vmem>>, vector<128x1xf32>
    tpu.vector_store %arg5[%c0_9, %c0_10], %5 {strides = array<i32>} : memref<128x1xf32, #tpu.memory_space<vmem>>, vector<128x1xf32>,
    %c0_11 = arith.constant 0 : index
    %c0_12 = arith.constant 0 : index
    %11 = vector.load %arg6[%c0_11, %c0_12] : memref<1x128xf32, #tpu.memory_space<vmem>>, vector<1x128xf32>
    tpu.vector_store %arg6[%c0_11, %c0_12], %7 {strides = array<i32>} : memref<1x128xf32, #tpu.memory_space<vmem>>, vector<1x128xf32>,
    return
  }
  func.func @transform_0(%arg0: i32) -> (i32, i32) {
    %c0_i32 = arith.constant 0 : i32
    %c0_i32_0 = arith.constant 0 : i32
    return %arg0, %c0_i32 : i32, i32
  }
  func.func @transform_1(%arg0: i32) -> (i32, i32) {
    %c0_i32 = arith.constant 0 : i32
    %c0_i32_0 = arith.constant 0 : i32
    %c0_i32_1 = arith.constant 0 : i32
    return %c0_i32, %c0_i32_0 : i32, i32
  }
  func.func @transform_2(%arg0: i32) -> (i32, i32) {
    %c0_i32 = arith.constant 0 : i32
    %c0_i32_0 = arith.constant 0 : i32
    %c0_i32_1 = arith.constant 0 : i32
    return %c0_i32, %c0_i32_0 : i32, i32
  }
  func.func @transform_3(%arg0: i32) -> (i32, i32) {
    %c0_i32 = arith.constant 0 : i32
    %c0_i32_0 = arith.constant 0 : i32
    return %arg0, %c0_i32 : i32, i32
  }
  func.func @transform_4(%arg0: i32) -> (i32, i32) {
    %c0_i32 = arith.constant 0 : i32
    %c0_i32_0 = arith.constant 0 : i32
    return %arg0, %c0_i32 : i32, i32
  }
  func.func @transform_5(%arg0: i32) -> (i32, i32) {
    %c0_i32 = arith.constant 0 : i32
    %c0_i32_0 = arith.constant 0 : i32
    return %c0_i32, %arg0 : i32, i32
  }
}

</mosaic_0001>

<bundles_post_ra>
// kernel: tpu_custom_call.1
= control target key start
LH: loop header
LB: loop body
LE: loop exit
PB: predicated region body
PF: predicated region fallthrough
CT: control target
= control target key end

     0   :  { %s1287_s0 = inlined_call_operand.vmem [shape: f32[512,64], index: 0, kind: input, shape index: {}]   ;;  %s1288_s1 = inlined_call_operand.vmem [shape: f32[64,128], index: 1, kind: input, shape index: {}]   ;;  %s1289_s2 = inlined_call_operand.vmem [shape: f32[2,64], index: 2, kind: input, shape index: {}]   ;;  %s1290_s3 = inlined_call_operand.hbm [shape: bf16[512,128], index: 3, kind: output, shape index: {0}]   ;;  %s1291_s4 = inlined_call_operand.vmem [shape: f32[512,1], index: 4, kind: output, shape index: {1}]   ;;  %s1292_s5 = inlined_call_operand.hbm [shape: f32[1,512], index: 5, kind: output, shape index: {2}]  }
   0x1   :  { %1293 = sst [smem:[#allocation8_spill]] %s1287_s0 }
   0x2   :  { %11 = vsyncpa [#allocation3], 0 }
   0x3   :  { %13 = vsyncpa [#allocation3 + $0x1], 0 }
   0x4   :  { %14 = vsyncpa [#allocation5], 0 }
   0x5   :  { %16 = vsyncpa [#allocation5 + $0x1], 0  ;;  %s969_s18 = smov 0   ;;  %s971_s19 = smov 0  }
   0x6   :  { %s973_s20 = smov 0   ;;  %s975_s21 = smov 0  }
   0x7 LB: > { %s990_s22 = sadd.s32 4294967295, %s935_s21   ;;  %s684_s23 = sadd.s32 4294967294, %s935_s21   ;;  %s935_s21 = sphi %s975_s21, %s1300_s21   ;;  %s931_s20 = sphi %s973_s20, %s1299_s20   ;;  %s927_s19 = sphi %s971_s19, %s1298_s19   ;;  %s923_s18 = sphi %s969_s18, %s1297_s18  }
   0x8   : > { %s994_s24 = sadd.s32 1, %s935_s21   ;;  %s97_s25 = sadd.s32 1, %s931_s20 }
   0x9   : > { %s94_s26 = ssub.s32 %s935_s21, %s994_s24  ;;  %p107_p0 = scmp.ne.s32.totalorder %s931_s20, %s927_s19 }
   0xa   : > { %p95_p1 = scmp.eq.s32.totalorder %s94_s26, 0  ;;  %p108_p2 = scmp.eq.s32.totalorder %s990_s22, 3 }
   0xb   : > { %p113_p3 = scmp.ne.s32.totalorder %s927_s19, %s923_s18  ;;  %p114_p4 = scmp.eq.s32.totalorder %s684_s23, 3 }
   0xc   : > { %s1005_s27 = scalar_select %p95_p1, %s931_s20, %s97_s25  }
   0xd   : > { %p1007_p5 = por %p108_p2, %p107_p0  ;;  %p1011_p6 = por %p114_p4, %p113_p3 }
   0xe   : > { %p687_p7 = scmp.ge.s32.totalorder %s935_s21, 1  ;;  %p199_p8 = scmp.lt.s32.totalorder %s935_s21, 5 }
  0x10   : > { %p200_p9 = pnand %p687_p7, %p199_p8 }
  0x11   : > { %s689_s9 = sshll.u32 (!%p200_p9), %s990_s22, 4  ;;  %s1296_s0 = sld [smem:[#allocation8_spill]] (!%p200_p9) }
  0x12   : > { %203 = sbr.rel (%p200_p9) target bundleno = 230 (0xe6), region = 32  ;;  %p237_p10 = scmp.lt.s32.totalorder (!%p200_p9), %s689_s9, 63 }
  0x13   : > { %s731_s23 = sshll.u32 (!%p200_p9), %s990_s22, 6  ;;  %s567_s11 = scalar_lea.hbm (!%p200_p9), %s1292_s5, %s990_s22 }
  0x14   : > { %s548_s30 = scalar_lea.hbm (!%p200_p9), %s1290_s3, %s731_s23  ;;  %s861_s26 = scalar_lea.hbm (!%p200_p9), %s1290_s3, 256 }
  0x15   : > { %s551_s7 = sshll.u32 (!%p200_p9), %s548_s30, 4  ;;  %s552_s7 = int_to_ptr.hbm [resolvable:$true] %s551_s7 }
  0x17   : > { %v272_v0 = vld [vmem:[%s1288_s1 + $0x38] sm:$0xff]  ;;  %v271_v1 = vld [vmem:[%s1288_s1 + $0x30] sm:$0xff]  ;;  %v270_v2 = vld [vmem:[%s1288_s1 + $0x28] sm:$0xff]  ;;  %s1302_s9 = smov (!%p237_p10, %s689_s9), 63  ;;  %vm273_vm0 = vcmask 523264   ;;  %vm509_vm1 = vcmask 7168  }
  0x18   : > { %779 = vmatpush.msra.mxu2 %v272_v0  ;;  %330 = vmatpush.msra.mxu0 %v272_v0  ;;  %v269_v3 = vld [vmem:[%s1288_s1 + $0x20] sm:$0xff]  ;;  %s690_s16 = sshll.u32 %s1302_s9, 3  ;;  %v268_v6 = vld [vmem:[%s1288_s1 + $0x18] sm:$0xff]  ;;  %v267_v8 = vld [vmem:[%s1288_s1 + $0x10] sm:$0xff]  ;;  %s1202_s9 = sand.u32 1, %s927_s19  }
  0x19   : > { %780 = vmatpush.msra.mxu3 %v272_v0  ;;  %v1035_v4 = vld [vmem:[%s1289_s2] sm:$0x3]  ;;  %s1046_s25 = scalar_lea.vmem %s1296_s0, %s690_s16  ;;  %v266_v12 = vld [vmem:[%s1288_s1 + $0x8] sm:$0xff]  ;;  %s1187_s15 = scalar_lea.vmem %s1291_s4, %s690_s16 }
  0x1a   : > { %781 = vmatpush.msra.mxu2 %v271_v1  ;;  %331 = vmatpush.msra.mxu0 %v271_v1  ;;  %v1039_v5 = vperm.slane %v1035_v4, 0  ;;  %v1052_v7 = vld [vmem:[%s1046_s25 + $0x78] sm:$0xff]  ;;  %v1060_v9 = vld [vmem:[%s1046_s25] sm:$0xff]  ;;  %v1063_v10 = vld [vmem:[%s1046_s25 + $0x70] sm:$0xff]  ;;  %v454_v58 = vrot.slane %v1035_v4, 1  ;;  %s688_s16 = sshll.u32 %s1202_s9, 6 }
  0x1b   : > { %782 = vmatpush.msra.mxu3 %v271_v1  ;;  %709 = vmatpush.xpose.msk.msra.mxu1 %vm273_vm0, %v1052_v7  ;;  %v265_v14 = vld [vmem:[%s1288_s1] sm:$0xff]  ;;  %v1077_v15 = vld [vmem:[%s1046_s25 + $0x30] sm:$0xff]  ;;  %v1080_v16 = vld [vmem:[%s1046_s25 + $0x68] sm:$0xff]  ;;  %s1211_s17 = scalar_lea.vmem [#allocation2], %s688_s16  ;;  %s235_s12 = scalar_lea.vmem [#allocation4], %s1202_s9 }
  0x1c   : > { %783 = vmatpush.msra.mxu2 %v270_v2  ;;  %332 = vmatpush.msra.mxu0 %v270_v2  ;;  %v389_v11 = vmul.f32 %v1039_v5, %v1060_v9  ;;  %v1083_v17 = vld [vmem:[%s1046_s25 + $0x8] sm:$0xff]  ;;  %v1086_v18 = vld [vmem:[%s1046_s25 + $0x10] sm:$0xff]  ;;  %v1089_v19 = vld [vmem:[%s1046_s25 + $0x20] sm:$0xff]  ;;  %v395_v33 = vmul.f32 %v1039_v5, %v1077_v15  ;;  %v403_v52 = vmul.f32 %v1039_v5, %v1063_v10  ;;  %s549_s6 = sshll.u32 %s1211_s17, 4  ;;  %s1245_s13 = sshll.u32 %s235_s12, 4  ;;  %s550_s6 = int_to_ptr.vmem [resolvable:$true] %s549_s6  ;;  %s570_s13 = int_to_ptr.vmem [resolvable:$true] %s1245_s13 }
  0x1d   : > { %784 = vmatpush.msra.mxu3 %v270_v2  ;;  %v393_v20 = vmul.f32 %v1039_v5, %v1089_v19  ;;  %v391_v21 = vmul.f32 %v1039_v5, %v1086_v18  ;;  %v390_v22 = vmul.f32 %v1039_v5, %v1083_v17  ;;  %v261_v23 = vld [vmem:[%s1046_s25 + $0x60] sm:$0xff]  ;;  %v256_v27 = vld [vmem:[%s1046_s25 + $0x38] sm:$0xff]  ;;  %v254_v30 = vld [vmem:[%s1046_s25 + $0x28] sm:$0xff]  ;;  %v402_v53 = vmul.f32 %v1039_v5, %v1080_v16  ;;  %s528_s14 = scalar_lea.sflag [#allocation3], %s1202_s9 }
  0x1e   : > { %785 = vmatpush.msra.mxu2 %v269_v3  ;;  %333 = vmatpush.msra.mxu0 %v269_v3  ;;  %v405_v13 = vsel %vm273_vm0, %v389_v11, 0.0  ;;  %v260_v28 = vld [vmem:[%s1046_s25 + $0x58] sm:$0xff]  ;;  %v394_v31 = vmul.f32 %v1039_v5, %v254_v30  ;;  %v259_v34 = vld [vmem:[%s1046_s25 + $0x50] sm:$0xff]  ;;  %v423_v37 = vsel %vm273_vm0, %v395_v33, 0.0  ;;  %v257_v38 = vld [vmem:[%s1046_s25 + $0x40] sm:$0xff]  ;;  %v396_v41 = vmul.f32 %v1039_v5, %v256_v27 }
  0x1f   : > { %786 = vmatpush.msra.mxu3 %v269_v3  ;;  %710 = vmatpush.xpose.msk.msra.mxu1 %vm273_vm0, %v1063_v10  ;;  %v417_v24 = vsel %vm273_vm0, %v393_v20, 0.0  ;;  %v411_v25 = vsel %vm273_vm0, %v391_v21, 0.0  ;;  %v408_v26 = vsel %vm273_vm0, %v390_v22, 0.0  ;;  %v252_v29 = vld [vmem:[%s1046_s25 + $0x18] sm:$0xff]  ;;  %v258_v39 = vld [vmem:[%s1046_s25 + $0x48] sm:$0xff]  ;;  %v397_v40 = vmul.f32 %v1039_v5, %v257_v38 }
  0x20   : > { %787 = vmatpush.msra.mxu2 %v268_v6  ;;  %334 = vmatpush.msra.mxu0 %v268_v6  ;;  %v392_v32 = vmul.f32 %v1039_v5, %v252_v29  ;;  %v420_v35 = vsel %vm273_vm0, %v394_v31, 0.0  ;;  %v398_v42 = vmul.f32 %v1039_v5, %v258_v39  ;;  %v426_v44 = vsel %vm273_vm0, %v396_v41, 0.0 }
  0x21   : > { %788 = vmatpush.msra.mxu3 %v268_v6  ;;  %406 = vadd.xlane.f32.xlu0 %v405_v13  ;;  %v429_v43 = vsel %vm273_vm0, %v397_v40, 0.0  ;;  %v400_v46 = vmul.f32 %v1039_v5, %v260_v28  ;;  %v399_v47 = vmul.f32 %v1039_v5, %v259_v34  ;;  %v401_v48 = vmul.f32 %v1039_v5, %v261_v23 }
  0x22   : > { %789 = vmatpush.msra.mxu2 %v267_v8  ;;  %335 = vmatpush.msra.mxu0 %v267_v8  ;;  %v414_v36 = vsel %vm273_vm0, %v392_v32, 0.0  ;;  %v432_v45 = vsel %vm273_vm0, %v398_v42, 0.0  ;;  %v447_v54 = vsel %vm273_vm0, %v403_v52, 0.0  ;;  %v404_v55 = vmul.f32 %v1039_v5, %v1052_v7 }
  0x23   : > { %790 = vmatpush.msra.mxu3 %v267_v8  ;;  %711 = vmatpush.xpose.msk.msra.mxu1 %vm273_vm0, %v1080_v16  ;;  %v438_v49 = vsel %vm273_vm0, %v400_v46, 0.0  ;;  %v435_v50 = vsel %vm273_vm0, %v399_v47, 0.0  ;;  %v441_v51 = vsel %vm273_vm0, %v401_v48, 0.0  ;;  %v444_v56 = vsel %vm273_vm0, %v402_v53, 0.0 }
  0x24   : > { %791 = vmatpush.msra.mxu2 %v266_v12  ;;  %336 = vmatpush.msra.mxu0 %v266_v12  ;;  %v450_v57 = vsel %vm273_vm0, %v404_v55, 0.0 }
  0x25   : > { %792 = vmatpush.msra.mxu3 %v266_v12  ;;  %418 = vadd.xlane.f32.xlu2 %v417_v24 }
  0x26   : > { %793 = vmatpush.msra.mxu2 %v265_v14  ;;  %337 = vmatpush.msra.mxu0 %v265_v14 }
  0x27   : > { %699 = vmatmul.msk.f32.vlgmr.msra.gmra.mxu2 %vm273_vm0, %v1077_v15  ;;  %693 = vmatmul.msk.f32.vlgmr.msra.gmra.mxu0 %vm273_vm0, %v1060_v9 }
  0x28   : > { %794 = vmatpush.msra.mxu3 %v265_v14  ;;  %412 = vadd.xlane.f32.xlu1 %v411_v25 }
  0x29   : > { %705 = vmatmul.msk.f32.vlgmr.msra.gmra.mxu3 %vm273_vm0, %v261_v23  ;;  %712 = vmatpush.xpose.msk.msra.mxu1 %vm273_vm0, %v261_v23 }
  0x2a   : > { %409 = vadd.xlane.f32.xlu0 %v408_v26 }
  0x2d   : > { %713 = vmatpush.xpose.msk.msra.mxu1 %vm273_vm0, %v260_v28  ;;  %421 = vadd.xlane.f32.xlu2 %v420_v35 }
  0x2f   : > { %700 = vmatmul.msk.f32.gmra.mxu2 %vm273_vm0, %v256_v27  ;;  %694 = vmatmul.msk.f32.gmra.mxu0 %vm273_vm0, %v1083_v17 }
  0x30   : > { %415 = vadd.xlane.f32.xlu1 %v414_v36 }
  0x31   : > { %706 = vmatmul.msk.f32.gmra.mxu3 %vm273_vm0, %v1080_v16  ;;  %714 = vmatpush.xpose.msk.msra.mxu1 %vm273_vm0, %v259_v34 }
  0x32   : > { %424 = vadd.xlane.f32.xlu0 %v423_v37 }
  0x35   : > { %715 = vmatpush.xpose.msk.msra.mxu1 %vm273_vm0, %v258_v39  ;;  %430 = vadd.xlane.f32.xlu2 %v429_v43 }
  0x37   : > { %701 = vmatmul.msk.f32.gmra.mxu2 %vm273_vm0, %v257_v38  ;;  %695 = vmatmul.msk.f32.gmra.mxu0 %vm273_vm0, %v1086_v18 }
  0x38   : > { %427 = vadd.xlane.f32.xlu1 %v426_v44 }
  0x39   : > { %707 = vmatmul.msk.f32.gmra.mxu3 %vm273_vm0, %v1063_v10  ;;  %716 = vmatpush.xpose.msk.msra.mxu1 %vm273_vm0, %v257_v38 }
  0x3a   : > { %433 = vadd.xlane.f32.xlu0 %v432_v45 }
  0x3d   : > { %717 = vmatpush.xpose.msk.msra.mxu1 %vm273_vm0, %v256_v27  ;;  %439 = vadd.xlane.f32.xlu2 %v438_v49 }
  0x3f   : > { %702 = vmatmul.msk.f32.gmra.mxu2 %vm273_vm0, %v258_v39  ;;  %696 = vmatmul.msk.f32.gmra.mxu0 %vm273_vm0, %v252_v29 }
  0x40   : > { %436 = vadd.xlane.f32.xlu1 %v435_v50 }
  0x41   : > { %708 = vmatmul.msk.f32.gmra.mxu3 %vm273_vm0, %v1052_v7  ;;  %718 = vmatpush.xpose.msk.msra.mxu1 %vm273_vm0, %v1077_v15 }
  0x42   : > { %442 = vadd.xlane.f32.xlu0 %v441_v51 }
  0x45   : > { %719 = vmatpush.xpose.msk.msra.mxu1 %vm273_vm0, %v254_v30  ;;  %448 = vadd.xlane.f32.xlu2 %v447_v54 }
  0x47   : > { %703 = vmatmul.msk.f32.gmra.mxu2 %vm273_vm0, %v259_v34  ;;  %697 = vmatmul.msk.f32.gmra.mxu0 %vm273_vm0, %v1089_v19 }
  0x48   : > { %445 = vadd.xlane.f32.xlu1 %v444_v56 }
  0x49   : > { %720 = vmatpush.xpose.msk.msra.mxu1 %vm273_vm0, %v1089_v19 }
  0x4a   : > { %451 = vadd.xlane.f32.xlu0 %v450_v57 }
  0x4d   : > { %721 = vmatpush.xpose.msk.msra.mxu1 %vm273_vm0, %v252_v29 }
  0x4f   : > { %704 = vmatmul.msk.f32.gmra.mxu2 %vm273_vm0, %v260_v28  ;;  %698 = vmatmul.msk.f32.gmra.mxu0 %vm273_vm0, %v254_v30 }
  0x51   : > { %722 = vmatpush.xpose.msk.msra.mxu1 %vm273_vm0, %v1086_v18 }
  0x55   : > { %723 = vmatpush.xpose.msk.msra.mxu1 %vm273_vm0, %v1083_v17 }
  0x59   : > { %724 = vmatpush.xpose.msk.msra.mxu1 %vm273_vm0, %v1060_v9 }
  0x5c   : > { %725 = vmatmul.msk.f32.vlgmr.msra.gmra.mxu1 %vm273_vm0, %v454_v58 }
  0x94   : > { %v407_v59 = vpop.xlane.xlu0 %406 }
  0x95   : > { %510 = vst.msk [vmem:[%s1187_s15] sm:$0xff] %vm509_vm1, %v407_v59 }
  0x98   : > { %v419_v60 = vpop.xlane.xlu2 %418 }
  0x99   : > { %514 = vst.msk [vmem:[%s1187_s15 + $0x20] sm:$0xff] %vm509_vm1, %v419_v60 }
  0x9b   : > { %v413_v61 = vpop.xlane.xlu1 %412 }
  0x9c   : > { %512 = vst.msk [vmem:[%s1187_s15 + $0x10] sm:$0xff] %vm509_vm1, %v413_v61 }
  0x9d   : > { %v410_v62 = vpop.xlane.xlu0 %409 }
  0x9e   : > { %511 = vst.msk [vmem:[%s1187_s15 + $0x8] sm:$0xff] %vm509_vm1, %v410_v62 }
  0xa0   : > { %v422_v63 = vpop.xlane.xlu2 %421 }
  0xa1   : > { %515 = vst.msk [vmem:[%s1187_s15 + $0x28] sm:$0xff] %vm509_vm1, %v422_v63 }
  0xa3   : > { %v416_v1 = vpop.xlane.xlu1 %415 }
  0xa4   : > { %v339_v0 = vpop.f32.mrf.mxu0  ;;  %513 = vst.msk [vmem:[%s1187_s15 + $0x18] sm:$0xff] %vm509_vm1, %v416_v1 }
  0xa5   : > { %v425_v2 = vpop.xlane.xlu0 %424 }
  0xa6   : > { %516 = vst.msk [vmem:[%s1187_s15 + $0x30] sm:$0xff] %vm509_vm1, %v425_v2 }
  0xa8   : > { %v431_v5 = vpop.xlane.xlu2 %430 }
  0xa9   : > { %518 = vst.msk [vmem:[%s1187_s15 + $0x40] sm:$0xff] %vm509_vm1, %v431_v5 }
  0xaa   : > { %v357_v3 = vpop.f32.mrf.mxu2 }
  0xab   : > { %v428_v7 = vpop.xlane.xlu1 %427 }
  0xac   : > { %v375_v4 = vpop.f32.mrf.mxu3  ;;  %v342_v6 = vpop.f32.mrf.mxu0  ;;  %517 = vst.msk [vmem:[%s1187_s15 + $0x38] sm:$0xff] %vm509_vm1, %v428_v7 }
  0xad   : > { %v735_v8 = vpack.c.bf16 %v342_v6, %v339_v0  ;;  %v434_v9 = vpop.xlane.xlu0 %433 }
  0xae   : > { %519 = vst.msk [vmem:[%s1187_s15 + $0x48] sm:$0xff] %vm509_vm1, %v434_v9 }
  0xaf   : > { %736 = vst [vmem:[%s1211_s17] sm:$0xff] %v735_v8  }
  0xb0   : > { %v440_v13 = vpop.xlane.xlu2 %439 }
  0xb1   : > { %521 = vst.msk [vmem:[%s1187_s15 + $0x58] sm:$0xff] %vm509_vm1, %v440_v13 }
  0xb2   : > { %v360_v10 = vpop.f32.mrf.mxu2 }
  0xb3   : > { %v750_v11 = vpack.c.bf16 %v360_v10, %v357_v3  ;;  %v437_v16 = vpop.xlane.xlu1 %436 }
  0xb4   : > { %v378_v12 = vpop.f32.mrf.mxu3  ;;  %v345_v14 = vpop.f32.mrf.mxu0  ;;  %520 = vst.msk [vmem:[%s1187_s15 + $0x50] sm:$0xff] %vm509_vm1, %v437_v16 }
  0xb5   : > { %774 = vst [vmem:[%s1211_s17 + $0x18] sm:$0xff] %v750_v11   ;;  %v765_v15 = vpack.c.bf16 %v378_v12, %v375_v4  ;;  %v443_v17 = vpop.xlane.xlu0 %442 }
  0xb6   : > { %522 = vst.msk [vmem:[%s1187_s15 + $0x60] sm:$0xff] %vm509_vm1, %v443_v17 }
  0xb7   : > { %777 = vst [vmem:[%s1211_s17 + $0x30] sm:$0xff] %v765_v15  }
  0xb8   : > { %v449_v20 = vpop.xlane.xlu2 %448 }
  0xb9   : > { %524 = vst.msk [vmem:[%s1187_s15 + $0x70] sm:$0xff] %vm509_vm1, %v449_v20 }
  0xba   : > { %v363_v18 = vpop.f32.mrf.mxu2 }
  0xbb   : > { %v446_v22 = vpop.xlane.xlu1 %445 }
  0xbc   : > { %v381_v19 = vpop.f32.mrf.mxu3  ;;  %v348_v21 = vpop.f32.mrf.mxu0  ;;  %523 = vst.msk [vmem:[%s1187_s15 + $0x68] sm:$0xff] %vm509_vm1, %v446_v22 }
  0xbd   : > { %v740_v23 = vpack.c.bf16 %v348_v21, %v345_v14  ;;  %v452_v24 = vpop.xlane.xlu0 %451 }
  0xbe   : > { %525 = vst.msk [vmem:[%s1187_s15 + $0x78] sm:$0xff] %vm509_vm1, %v452_v24  ;;  %s855_s15 = sshra.s32 %s552_s7, 4  ;;  %s856_s15 = int_to_ptr.hbm [resolvable:$true] %s855_s15 }
  0xbf   : > { %772 = vst [vmem:[%s1211_s17 + $0x8] sm:$0xff] %v740_v23   ;;  %s857_s16 = scalar_lea.hbm %s856_s15, 64  ;;  %p862_p0 = scmp.lt.s32.totalorder %s856_s15, %s1290_s3 }
  0xc0   : > { %p858_p11 = scmp.ne.s32.totalorder %s856_s15, %s857_s16  ;;  %p863_p1 = scmp.lt.s32.totalorder %s861_s26, %s857_s16 }
  0xc2   : > { %v366_v25 = vpop.f32.mrf.mxu2  ;;  %p859_p12 = pnand %p858_p11, %p1007_p5  ;;  %p864_p2 = por %p863_p1, %p862_p0 }
  0xc3   : > { %v755_v26 = vpack.c.bf16 %v366_v25, %v363_v18 }
  0xc4   : > { %v384_v27 = vpop.f32.mrf.mxu3  ;;  %v351_v28 = vpop.f32.mrf.mxu0  ;;  %p860_p13 = pneg %p859_p12 }
  0xc5   : > { %775 = vst [vmem:[%s1211_s17 + $0x20] sm:$0xff] %v755_v26   ;;  %v770_v29 = vpack.c.bf16 %v384_v27, %v381_v19 }
  0xc6   : > { %p865_p3 = pnand %p864_p2, %p860_p13 }
  0xc7   : > { %778 = vst [vmem:[%s1211_s17 + $0x38] sm:$0xff] %v770_v29  }
  0xca   : > { %v369_v30 = vpop.f32.mrf.mxu2 }
  0xcc   : > { %v354_v31 = vpop.f32.mrf.mxu0 }
  0xcd   : > { %v745_v32 = vpack.c.bf16 %v354_v31, %v351_v28 }
  0xcf   : > { %773 = vst [vmem:[%s1211_s17 + $0x10] sm:$0xff] %v745_v32  }
  0xd2   : > { %v372_v33 = vpop.f32.mrf.mxu2 }
  0xd3   : > { %v760_v34 = vpack.c.bf16 %v372_v33, %v369_v30 }
  0xd5   : > { %776 = vst [vmem:[%s1211_s17 + $0x28] sm:$0xff] %v760_v34  }
  0xd6   : > { %868 = shalt.err (!%p865_p3)
}
  0xd7   : > { %s937_s22 = smov 64   ;;  %s938_s17 = smov 4  }
  0xd8   : > { %795 = dma.vmem_to_hbm [thread:$0]  (%p1007_p5), %s550_s6, 1024, %s552_s7, %s528_s14, %s937_s22, %s937_s22, %s938_s17  }
  0xd9   : > { %s571_s8 = sshll.u32 %s567_s11, 4  ;;  %v474_v35 = vpop.f32.mrf.mxu1  ;;  %s538_s10 = scalar_lea.sflag [#allocation5], %s1202_s9  ;;  %s572_s8 = int_to_ptr.hbm [resolvable:$true] %s571_s8 }
  0xda   : > { %526 = vst [vmem:[%s235_s12] sm:$0x1] %v474_v35  ;;  %s883_s0 = sshra.s32 %s572_s8, 4  ;;  %s889_s25 = scalar_lea.hbm %s1292_s5, 4  ;;  %s884_s0 = int_to_ptr.hbm [resolvable:$true] %s883_s0 }
  0xdb   : > { %s885_s15 = scalar_lea.hbm %s884_s0, 1  ;;  %p890_p9 = scmp.lt.s32.totalorder %s884_s0, %s1292_s5 }
  0xdc   : > { %p886_p4 = scmp.ne.s32.totalorder %s884_s0, %s885_s15  ;;  %p891_p10 = scmp.lt.s32.totalorder %s889_s25, %s885_s15 }
  0xde   : > { %p887_p7 = pnand %p886_p4, %p1007_p5  ;;  %p892_p11 = por %p891_p10, %p890_p9 }
  0xe0   : > { %p888_p8 = pneg %p887_p7 }
  0xe2   : > { %p893_p12 = pnand %p892_p11, %p888_p8 }
  0xe4   : > { %896 = shalt.err (!%p893_p12)
}
  0xe5   : > { %796 = dma.vmem_to_hbm [thread:$0]  (%p1007_p5), %s570_s13, 16, %s572_s8, %s538_s10  }
  0xe6 PF: > { %p806_p13 = scmp.ge.s32.totalorder %s935_s21, 2  ;;  %s583_s9 = sand.u32 1, %s923_s18  }
  0xe7   : > { %s584_s6 = scalar_lea.sflag [#allocation3], %s583_s9 }
  0xe8   : > { %p800_p0 = pnand %p806_p13, %p1011_p6 }
  0xea   : > { %p801_p1 = pneg %p800_p0 }
  0xec   : > { %914 = dma.done.wait (%p801_p1), %s584_s6, 1024  }
  0xed   : > { %916 = vsyncadd (%p801_p1), %s584_s6, 4294966272  ;;  %s602_s7 = scalar_lea.sflag [#allocation5], %s583_s9 }
  0xee   : > { %918 = dma.done.wait (%p801_p1), %s602_s7, 16  }
  0xef   : > { %920 = vsyncadd (%p801_p1), %s602_s7, 4294967280  ;;  %p19_p5 = scmp.ge.s32.totalorder %s994_s24, 6   ;;  %s1297_s18 = smov %s927_s19 }
  0xf0   : > { %s1298_s19 = smov %s931_s20  ;;  %s1299_s20 = smov %s1005_s27 }
  0xf1   : > { %s1300_s21 = smov %s994_s24  ;;  %21 = sbr.rel (!%p19_p5) target bundleno = 7 (0x7), region = 96 }
  0xf6   :  { %607 = vsyncpa [#allocation3], 1 }
  0xf7   :  { %609 = vsyncpa [#allocation3 + $0x1], 1 }
  0xf8   :  { %610 = vsyncpa [#allocation5], 1 }
  0xf9   :  { %612 = vsyncpa [#allocation5 + $0x1], 1 }

</bundles_post_ra>
